<compile_context>
chip_gen: v5e
topology: v5e:2x2
jax: 0.10.0
libtpu: 0.0.40
codegen_flags: <defaults>
</compile_context>

<pallas_src>
import functools

import jax
import jax.numpy as jnp
from jax.experimental import pallas as pl
from jax.experimental.pallas import tpu as pltpu

LANE = 128
SUBLANE = 8
_VMEM_LIMIT = 48 * 1024 * 1024
# X is double-buffered by the pipeline even with a constant block index, so keep
# this conservative (effective VMEM cost ~= 2x this value).
_X_RESIDENT_BUDGET = 6 * 1024 * 1024


def _round_up(x, m):
    return ((x + m - 1) // m) * m


def _pad2(x, rows, cols):
    return jnp.pad(x, ((0, rows - x.shape[0]), (0, cols - x.shape[1])))


def _pick_tile(n_lane_padded):
    """128-aligned tiles on v4/v5 (4x128^2 MXU), 256 on v6e/v7x (2x256^2 MXU)."""
    try:
        kind = jax.devices()[0].device_kind.lower()
    except Exception:  # pragma: no cover - defensive
        kind = ""
    target = 128 if ("v4" in kind or "v5" in kind) else 256
    return min(target, n_lane_padded)


# ----------------------------------------------------------------------------
# Kernels
# ----------------------------------------------------------------------------
def gcn_layer_kernel(a_ref, x_ref, w_ref, b_ref, o_ref, acc_ref, *, tile, x_resident):
    """One GCN layer, aggregate-first:  relu( (A_hat @ X) @ W + b ).

    grid = (row_tiles [parallel], contraction_tiles [arbitrary]).
    acc_ref : f32 VMEM accumulator of shape (tile, fin_pad).
    If x_resident, x_ref holds the whole padded X and we slice the current
    contraction tile out of VMEM (no per-row-tile HBM re-fetch).
    """
    k = pl.program_id(1)

    @pl.when(k == 0)
    def _():
        acc_ref[...] = jnp.zeros_like(acc_ref)

    if x_resident:
        off = pl.multiple_of(k * tile, tile)
        x_blk = x_ref[pl.ds(off, tile), :]
    else:
        x_blk = x_ref[...]

    acc_ref[...] += jnp.dot(a_ref[...], x_blk,
                            preferred_element_type=jnp.float32)

    @pl.when(k == pl.num_programs(1) - 1)
    def _():
        h = jnp.dot(acc_ref[...].astype(jnp.bfloat16), w_ref[...],
                    preferred_element_type=jnp.float32) + b_ref[...]
        o_ref[...] = jnp.maximum(h, 0.0).astype(o_ref.dtype)


def pool_classify_kernel(p_ref, h_ref, wc_ref, bc_ref, o_ref, acc_ref):
    """global_mean_pool (matmul with the pool matrix) + Linear classifier.

    grid = (contraction_tiles [arbitrary],).
    acc_ref : f32 VMEM accumulator of shape (g_pad, h_pad).
    """
    k = pl.program_id(0)

    @pl.when(k == 0)
    def _():
        acc_ref[...] = jnp.zeros_like(acc_ref)

    acc_ref[...] += jnp.dot(p_ref[...], h_ref[...],
                            preferred_element_type=jnp.float32)

    @pl.when(k == pl.num_programs(0) - 1)
    def _():
        o_ref[...] = (jnp.dot(acc_ref[...].astype(jnp.bfloat16), wc_ref[...],
                              preferred_element_type=jnp.float32) + bc_ref[...])


# ----------------------------------------------------------------------------
# Forward pass
# ----------------------------------------------------------------------------
def gnn_forward(a_hat, x, w1, b1, w2, b2, pool, wc, bc):
    n = a_hat.shape[0]
    f_in, hid = w1.shape
    _, n_cls = wc.shape
    n_graphs = pool.shape[0]

    # Lane-dense padded dims.
    f_p = _round_up(f_in, LANE)
    h_p = _round_up(hid, LANE)
    c_p = _round_up(n_cls, LANE)
    g_p = _round_up(n_graphs, SUBLANE)

    tile = _pick_tile(_round_up(n, LANE))
    n_p = _round_up(n, tile)
    m_tiles = n_p // tile
    k_tiles = n_p // tile

    bf16 = jnp.bfloat16
    a_p = _pad2(a_hat, n_p, n_p).astype(bf16)
    x_p = _pad2(x, n_p, f_p).astype(bf16)
    w1_p = _pad2(w1, f_p, h_p).astype(bf16)
    w2_p = _pad2(w2, h_p, h_p).astype(bf16)
    wc_p = _pad2(wc, h_p, c_p).astype(bf16)
    b1_p = _pad2(b1, 1, h_p).astype(jnp.float32)
    b2_p = _pad2(b2, 1, h_p).astype(jnp.float32)
    bc_p = _pad2(bc, 1, c_p).astype(jnp.float32)
    pool_p = _pad2(pool, g_p, n_p).astype(bf16)

    layer_params = pltpu.CompilerParams(
        dimension_semantics=("parallel", "arbitrary"),
        vmem_limit_bytes=_VMEM_LIMIT)
    pool_params = pltpu.CompilerParams(
        dimension_semantics=("arbitrary",),
        vmem_limit_bytes=_VMEM_LIMIT)

    def gcn_layer(a, xin, w, b, fin_p, fout_p):
        x_resident = (n_p * fin_p * 2) <= _X_RESIDENT_BUDGET
        if x_resident:
            x_spec = pl.BlockSpec((n_p, fin_p), lambda i, k: (0, 0))   # fetched once
        else:
            x_spec = pl.BlockSpec((tile, fin_p), lambda i, k: (k, 0))  # streamed per k
        kernel = functools.partial(gcn_layer_kernel, tile=tile,
                                   x_resident=x_resident)
        return pl.pallas_call(
            kernel,
            out_shape=jax.ShapeDtypeStruct((n_p, fout_p), bf16),
            grid=(m_tiles, k_tiles),
            in_specs=[
                pl.BlockSpec((tile, tile), lambda i, k: (i, k)),      # A_hat tile
                x_spec,                                               # X
                pl.BlockSpec((fin_p, fout_p), lambda i, k: (0, 0)),   # W (resident)
                pl.BlockSpec((1, fout_p), lambda i, k: (0, 0)),       # bias
            ],
            out_specs=pl.BlockSpec((tile, fout_p), lambda i, k: (i, 0)),
            scratch_shapes=[pltpu.VMEM((tile, fin_p), jnp.float32)],
            compiler_params=layer_params,
        )(a, xin, w, b)

    h1 = gcn_layer(a_p, x_p, w1_p, b1_p, f_p, h_p)     # [n_p, h_p] bf16
    h2 = gcn_layer(a_p, h1, w2_p, b2_p, h_p, h_p)      # [n_p, h_p] bf16

    out_padded = pl.pallas_call(
        pool_classify_kernel,
        out_shape=jax.ShapeDtypeStruct((g_p, c_p), jnp.float32),
        grid=(k_tiles,),
        in_specs=[
            pl.BlockSpec((g_p, tile), lambda k: (0, k)),              # pool tile
            pl.BlockSpec((tile, h_p), lambda k: (k, 0)),              # H2 tile
            pl.BlockSpec((h_p, c_p), lambda k: (0, 0)),               # Wc (resident)
            pl.BlockSpec((1, c_p), lambda k: (0, 0)),                 # bc
        ],
        out_specs=pl.BlockSpec((g_p, c_p), lambda k: (0, 0)),
        scratch_shapes=[pltpu.VMEM((g_p, h_p), jnp.float32)],
        compiler_params=pool_params,
    )(pool_p, h2, wc_p, bc_p)

    return out_padded[:n_graphs, :n_cls]


# ----------------------------------------------------------------------------
# Graph preprocessing (plain JAX glue)
# ----------------------------------------------------------------------------
def build_normalized_adjacency(edge_index, num_nodes):
    """PyG GCNConv default: add remaining self loops, symmetric normalization."""
    src, dst = edge_index[0], edge_index[1]
    adj = jnp.zeros((num_nodes, num_nodes), jnp.float32)
    adj = adj.at[src, dst].set(1.0)
    diag = jnp.arange(num_nodes)
    adj = adj.at[diag, diag].set(1.0)   # diagonal exactly 1 even if self loops exist
    deg = adj.sum(axis=1)
    dinv = jnp.where(deg > 0, 1.0 / jnp.sqrt(deg), 0.0)
    return dinv[:, None] * adj * dinv[None, :]


def build_pool_matrix(batch, num_graphs):
    onehot = (batch[None, :] == jnp.arange(num_graphs)[:, None]).astype(jnp.float32)
    counts = onehot.sum(axis=1, keepdims=True)
    return onehot / jnp.maximum(counts, 1.0)                   # [G, N]


if __name__ == "__main__":
    # Small deterministic problem: 16 nodes, 2 graphs, F=8, H=32, C=4.
    N, F, H, C, G = 16, 8, 32, 4, 2

    key = jax.random.PRNGKey(0)
    k_x, k_w1, k_w2, k_wc, k_b1, k_b2, k_bc = jax.random.split(key, 7)

    x = jax.random.normal(k_x, (N, F), jnp.float32)

    # Undirected ring within each graph of 8 nodes (edges both directions).
    edges = []
    for g in range(G):
        base = g * 8
        for i in range(8):
            a, b = base + i, base + (i + 1) % 8
            edges.append((a, b))
            edges.append((b, a))
    edge_index = jnp.array(edges, dtype=jnp.int32).T            # [2, E]
    batch = jnp.concatenate([jnp.zeros(8, jnp.int32), jnp.ones(8, jnp.int32)])

    # Deterministic synthetic parameters (GCNConv weight [in, out] + bias; Linear).
    w1 = jax.random.normal(k_w1, (F, H), jnp.float32) * 0.1
    b1 = jax.random.normal(k_b1, (1, H), jnp.float32) * 0.1
    w2 = jax.random.normal(k_w2, (H, H), jnp.float32) * 0.1
    b2 = jax.random.normal(k_b2, (1, H), jnp.float32) * 0.1
    wc = jax.random.normal(k_wc, (H, C), jnp.float32) * 0.1
    bc = jax.random.normal(k_bc, (1, C), jnp.float32) * 0.1

    a_hat = build_normalized_adjacency(edge_index, N)
    pool = build_pool_matrix(batch, G)

    out = gnn_forward(a_hat, x, w1, b1, w2, b2, pool, wc, bc)
    out = jax.block_until_ready(out)

    # Plain-JAX f32 reference (kernel runs bf16 operands with f32 accumulation).
    h_ref = jnp.maximum(a_hat @ (x @ w1) + b1, 0.0)
    h_ref = jnp.maximum(a_hat @ (h_ref @ w2) + b2, 0.0)
    ref = pool @ h_ref @ wc + bc

    assert out.shape == (G, C)
    assert jnp.allclose(out, ref, atol=2e-2, rtol=2e-2), "mismatch vs reference"

    print("KERNEL_OK")
</pallas_src>

<mosaic_0001>
module attributes {stable_mosaic.version = 11 : i64} {
  func.func @gcn_layer_kernel(%arg0: i32, %arg1: i32, %arg2: memref<128x128xbf16, #tpu.memory_space<vmem>>, %arg3: memref<128x128xbf16, #tpu.memory_space<vmem>>, %arg4: memref<128x128xbf16, #tpu.memory_space<vmem>>, %arg5: memref<1x128xf32, #tpu.memory_space<vmem>>, %arg6: memref<128x128xbf16, #tpu.memory_space<vmem>>, %arg7: memref<128x128xf32, #tpu.memory_space<vmem>>) attributes {dimension_semantics = [#tpu.dimension_semantics<parallel>, #tpu.dimension_semantics<arbitrary>], iteration_bounds = array<i64: 1, 1>, scalar_prefetch = 0 : i64, scratch_operands = 1 : i64, tpu.core_type = #tpu.core_type<tc>, window_params = [{transform_indices = @transform_0, window_bounds = array<i64: 128, 128>}, {pipeline_mode = #tpu.pipeline_mode<synchronous>, transform_indices = @transform_1, window_bounds = array<i64: 128, 128>}, {pipeline_mode = #tpu.pipeline_mode<synchronous>, transform_indices = @transform_2, window_bounds = array<i64: 128, 128>}, {pipeline_mode = #tpu.pipeline_mode<synchronous>, transform_indices = @transform_3, window_bounds = array<i64: 1, 128>}, {transform_indices = @transform_4, window_bounds = array<i64: 128, 128>}]} {
    %c0_i32 = arith.constant 0 : i32
    %0 = arith.cmpi eq, %arg1, %c0_i32 : i32
    %1 = arith.extui %0 : i1 to i32
    %c0_i32_0 = arith.constant 0 : i32
    %2 = arith.cmpi ne, %1, %c0_i32_0 : i32
    scf.if %2 {
      %cst_9 = arith.constant 0.000000e+00 : f32
      %15 = vector.broadcast %cst_9 : f32 to vector<128x128xf32>
      %c0_10 = arith.constant 0 : index
      %c0_11 = arith.constant 0 : index
      %16 = vector.load %arg7[%c0_10, %c0_11] : memref<128x128xf32, #tpu.memory_space<vmem>>, vector<128x128xf32>
      tpu.vector_store %arg7[%c0_10, %c0_11], %15 {strides = array<i32>} : memref<128x128xf32, #tpu.memory_space<vmem>>, vector<128x128xf32>,
    } else {
    }
    %c128_i32 = arith.constant 128 : i32
    %3 = arith.muli %arg1, %c128_i32 : i32
    %4 = tpu.assume_multiple %3, 128 : i32
    %5 = arith.index_cast %4 : i32 to index
    %c0 = arith.constant 0 : index
    %6 = vector.load %arg3[%5, %c0] : memref<128x128xbf16, #tpu.memory_space<vmem>>, vector<128x128xbf16>
    %c0_1 = arith.constant 0 : index
    %c0_2 = arith.constant 0 : index
    %7 = vector.load %arg7[%c0_1, %c0_2] : memref<128x128xf32, #tpu.memory_space<vmem>>, vector<128x128xf32>
    %c0_3 = arith.constant 0 : index
    %c0_4 = arith.constant 0 : index
    %8 = vector.load %arg2[%c0_3, %c0_4] : memref<128x128xbf16, #tpu.memory_space<vmem>>, vector<128x128xbf16>
    %cst = arith.constant dense<0.000000e+00> : vector<128x128xf32>
    %9 = tpu.matmul %8, %6, %cst {dimension_numbers = #tpu.dot_dimension_numbers<[1], [0], [0], [1], [0, 0, 1, 1], [], []>} : vector<128x128xbf16>, vector<128x128xbf16>, vector<128x128xf32> -> vector<128x128xf32>
    %10 = arith.addf %7, %9 : vector<128x128xf32>
    %c0_5 = arith.constant 0 : index
    %c0_6 = arith.constant 0 : index
    %11 = vector.load %arg7[%c0_5, %c0_6] : memref<128x128xf32, #tpu.memory_space<vmem>>, vector<128x128xf32>
    tpu.vector_store %arg7[%c0_5, %c0_6], %10 {strides = array<i32>} : memref<128x128xf32, #tpu.memory_space<vmem>>, vector<128x128xf32>,
    %c0_i32_7 = arith.constant 0 : i32
    %12 = arith.cmpi eq, %arg1, %c0_i32_7 : i32
    %13 = arith.extui %12 : i1 to i32
    %c0_i32_8 = arith.constant 0 : i32
    %14 = arith.cmpi ne, %13, %c0_i32_8 : i32
    scf.if %14 {
      %c0_9 = arith.constant 0 : index
      %c0_10 = arith.constant 0 : index
      %15 = vector.load %arg7[%c0_9, %c0_10] : memref<128x128xf32, #tpu.memory_space<vmem>>, vector<128x128xf32>
      %16 = arith.truncf %15 : vector<128x128xf32> to vector<128x128xbf16>
      %c0_11 = arith.constant 0 : index
      %c0_12 = arith.constant 0 : index
      %17 = vector.load %arg4[%c0_11, %c0_12] : memref<128x128xbf16, #tpu.memory_space<vmem>>, vector<128x128xbf16>
      %cst_13 = arith.constant dense<0.000000e+00> : vector<128x128xf32>
      %18 = tpu.matmul %16, %17, %cst_13 {dimension_numbers = #tpu.dot_dimension_numbers<[1], [0], [0], [1], [0, 0, 1, 1], [], []>} : vector<128x128xbf16>, vector<128x128xbf16>, vector<128x128xf32> -> vector<128x128xf32>
      %c0_14 = arith.constant 0 : index
      %c0_15 = arith.constant 0 : index
      %19 = vector.load %arg5[%c0_14, %c0_15] : memref<1x128xf32, #tpu.memory_space<vmem>>, vector<1x128xf32>
      %20 = vector.broadcast %19 : vector<1x128xf32> to vector<128x128xf32>
      %21 = arith.addf %18, %20 : vector<128x128xf32>
      %cst_16 = arith.constant 0.000000e+00 : f32
      %22 = vector.broadcast %cst_16 : f32 to vector<128x128xf32>
      %23 = arith.maximumf %21, %22 : vector<128x128xf32>
      %24 = arith.truncf %23 : vector<128x128xf32> to vector<128x128xbf16>
      %c0_17 = arith.constant 0 : index
      %c0_18 = arith.constant 0 : index
      %25 = vector.load %arg6[%c0_17, %c0_18] : memref<128x128xbf16, #tpu.memory_space<vmem>>, vector<128x128xbf16>
      tpu.vector_store %arg6[%c0_17, %c0_18], %24 {strides = array<i32>} : memref<128x128xbf16, #tpu.memory_space<vmem>>, vector<128x128xbf16>,
    } else {
    }
    return
  }
  func.func @transform_0(%arg0: i32, %arg1: i32) -> (i32, i32) {
    %c0_i32 = arith.constant 0 : i32
    return %arg0, %arg1 : i32, i32
  }
  func.func @transform_1(%arg0: i32, %arg1: i32) -> (i32, i32) {
    %c0_i32 = arith.constant 0 : i32
    %c0_i32_0 = arith.constant 0 : i32
    %c0_i32_1 = arith.constant 0 : i32
    return %c0_i32, %c0_i32_0 : i32, i32
  }
  func.func @transform_2(%arg0: i32, %arg1: i32) -> (i32, i32) {
    %c0_i32 = arith.constant 0 : i32
    %c0_i32_0 = arith.constant 0 : i32
    %c0_i32_1 = arith.constant 0 : i32
    return %c0_i32, %c0_i32_0 : i32, i32
  }
  func.func @transform_3(%arg0: i32, %arg1: i32) -> (i32, i32) {
    %c0_i32 = arith.constant 0 : i32
    %c0_i32_0 = arith.constant 0 : i32
    %c0_i32_1 = arith.constant 0 : i32
    return %c0_i32, %c0_i32_0 : i32, i32
  }
  func.func @transform_4(%arg0: i32, %arg1: i32) -> (i32, i32) {
    %c0_i32 = arith.constant 0 : i32
    %c0_i32_0 = arith.constant 0 : i32
    return %arg0, %c0_i32 : i32, i32
  }
}

</mosaic_0001>

<bundles_post_ra>
// kernel: tpu_custom_call.1
= control target key start
LH: loop header
LB: loop body
LE: loop exit
PB: predicated region body
PF: predicated region fallthrough
CT: control target
= control target key end

     0   :  { %9 = vsyncpa [#allocation4], 0  ;;  %s879_s0 = inlined_call_operand.hbm [shape: bf16[128,128], index: 0, kind: input, shape index: {}]   ;;  %s880_s1 = inlined_call_operand.hbm [shape: bf16[128,128], index: 1, kind: input, shape index: {}]   ;;  %s881_s2 = inlined_call_operand.hbm [shape: bf16[128,128], index: 2, kind: input, shape index: {}]   ;;  %s882_s3 = inlined_call_operand.vmem [shape: f32[1,128], index: 3, kind: input, shape index: {}]   ;;  %s883_s4 = inlined_call_operand.hbm [shape: bf16[128,128], index: 4, kind: output, shape index: {}]  }
   0x1   :  { %10 = vsyncpa [#allocation7], 0 }
   0x2   :  { %11 = vsyncpa [#allocation5], 0  ;;  %s29_s17 = sshll.u32 %s880_s1, 4  ;;  %s821_s18 = smov [#allocation6]   ;;  %s30_s17 = int_to_ptr.hbm [resolvable:$true] %s29_s17 }
   0x3   :  { %s31_s19 = sshll.u32 %s821_s18, 4  ;;  %s16_s22 = sshll.u32 %s879_s0, 4  ;;  %s32_s19 = int_to_ptr.vmem [resolvable:$true] %s31_s19  ;;  %s17_s22 = int_to_ptr.hbm [resolvable:$true] %s16_s22 }
   0x4   :  { %s822_s23 = smov 64   ;;  %s823_s24 = smov 4  }
   0x5   :  { %37 = dma.hbm_to_vmem [thread:$0]  %s30_s17, 1024, %s32_s19, [#allocation7], %s822_s23, %s822_s23, %s823_s24  }
   0x6   :  { %s824_s25 = smov [#allocation3]   ;;  %s42_s1 = sshll.u32 %s881_s2, 4  ;;  %s43_s1 = int_to_ptr.hbm [resolvable:$true] %s42_s1 }
   0x7   :  { %s18_s26 = sshll.u32 %s824_s25, 4  ;;  %s825_s0 = smov [#allocation8]   ;;  %s19_s26 = int_to_ptr.vmem [resolvable:$true] %s18_s26 }
   0x8   :  { %24 = dma.hbm_to_vmem [thread:$0]  %s17_s22, 1024, %s19_s26, [#allocation4], %s822_s23, %s822_s23, %s823_s24  }
   0x9   :  { %s44_s29 = sshll.u32 %s825_s0, 4  ;;  %s45_s29 = int_to_ptr.vmem [resolvable:$true] %s44_s29 }
   0xa   :  { %50 = dma.hbm_to_vmem [thread:$0]  %s43_s1, 1024, %s45_s29, [#allocation7], %s822_s23, %s822_s23, %s823_s24  }
   0xb   :  { %815 = dma.done.wait [#allocation4], 1024  }
   0xc   :  { %816 = vsyncadd [#allocation4], 4294966272 }
   0xd   :  { %817 = dma.done.wait [#allocation7], 2048  }
   0xe   :  { %818 = vsyncadd [#allocation7], 4294965248  ;;  %v632_v0 = vld [vmem:[#allocation6 + $0x38] sm:$0xff]  ;;  %v631_v1 = vld [vmem:[#allocation6 + $0x30] sm:$0xff]  ;;  %s513_s8 = sshll.u32 %s883_s4, 4  ;;  %s514_s8 = int_to_ptr.hbm [resolvable:$true] %s513_s8 }
   0xf   :  { %234 = vmatpush.bf16.msra.mxu0 %v632_v0  ;;  %696 = vmatpush.bf16.msra.mxu2 %v632_v0  ;;  %v630_v2 = vld [vmem:[#allocation6 + $0x28] sm:$0xff]  ;;  %v629_v3 = vld [vmem:[#allocation6 + $0x20] sm:$0xff]  ;;  %v628_v4 = vld [vmem:[#allocation6 + $0x18] sm:$0xff] }
  0x10   :  { %v627_v5 = vld [vmem:[#allocation6 + $0x10] sm:$0xff]  ;;  %v626_v6 = vld [vmem:[#allocation6 + $0x8] sm:$0xff]  ;;  %v625_v7 = vld [vmem:[#allocation6] sm:$0xff] }
  0x11   :  { %v633_v8 = vld [vmem:[#allocation3] sm:$0xff]  ;;  %v634_v10 = vld [vmem:[#allocation3 + $0x8] sm:$0xff]  ;;  %v648_v12 = vld [vmem:[#allocation8 + $0x38] sm:$0xff] }
  0x12   :  { %v637_v9 = vld [vmem:[#allocation3 + $0x20] sm:$0xff]  ;;  %v638_v11 = vld [vmem:[#allocation3 + $0x28] sm:$0xff]  ;;  %410 = vmatpush.bf16.msra.mxu1 %v648_v12  ;;  %v647_v13 = vld [vmem:[#allocation8 + $0x30] sm:$0xff]  ;;  %704 = vmatpush.bf16.msra.mxu3 %v648_v12 }
  0x13   :  { %235 = vmatpush.bf16.msra.mxu0 %v631_v1  ;;  %697 = vmatpush.bf16.msra.mxu2 %v631_v1  ;;  %v646_v14 = vld [vmem:[#allocation8 + $0x28] sm:$0xff]  ;;  %v645_v15 = vld [vmem:[#allocation8 + $0x20] sm:$0xff]  ;;  %v635_v16 = vld [vmem:[#allocation3 + $0x10] sm:$0xff] }
  0x14   :  { %v639_v17 = vld [vmem:[#allocation3 + $0x30] sm:$0xff]  ;;  %v644_v18 = vld [vmem:[#allocation8 + $0x18] sm:$0xff]  ;;  %v642_v22 = vld [vmem:[#allocation8 + $0x8] sm:$0xff] }
  0x15   :  { %v636_v19 = vld [vmem:[#allocation3 + $0x18] sm:$0xff]  ;;  %v643_v21 = vld [vmem:[#allocation8 + $0x10] sm:$0xff]  ;;  %v641_v23 = vld [vmem:[#allocation8] sm:$0xff] }
  0x16   :  { %411 = vmatpush.bf16.msra.mxu1 %v647_v13  ;;  %705 = vmatpush.bf16.msra.mxu3 %v647_v13  ;;  %v640_v20 = vld [vmem:[#allocation3 + $0x38] sm:$0xff]  ;;  %v718_v49 = vld [vmem:[%s882_s3] ss:$0 sm:$0xff]  ;;  %s826_s3 = smov [#allocation9]  }
  0x17   :  { %236 = vmatpush.bf16.msra.mxu0 %v630_v2  ;;  %698 = vmatpush.bf16.msra.mxu2 %v630_v2  ;;  %s511_s5 = sshll.u32 %s826_s3, 4  ;;  %s512_s5 = int_to_ptr.vmem [resolvable:$true] %s511_s5 }
  0x1a   :  { %412 = vmatpush.bf16.msra.mxu1 %v646_v14  ;;  %706 = vmatpush.bf16.msra.mxu3 %v646_v14 }
  0x1b   :  { %237 = vmatpush.bf16.msra.mxu0 %v629_v3  ;;  %699 = vmatpush.bf16.msra.mxu2 %v629_v3 }
  0x1e   :  { %413 = vmatpush.bf16.msra.mxu1 %v645_v15  ;;  %707 = vmatpush.bf16.msra.mxu3 %v645_v15 }
  0x1f   :  { %238 = vmatpush.bf16.msra.mxu0 %v628_v4  ;;  %700 = vmatpush.bf16.msra.mxu2 %v628_v4 }
  0x22   :  { %414 = vmatpush.bf16.msra.mxu1 %v644_v18  ;;  %708 = vmatpush.bf16.msra.mxu3 %v644_v18 }
  0x23   :  { %239 = vmatpush.bf16.msra.mxu0 %v627_v5  ;;  %701 = vmatpush.bf16.msra.mxu2 %v627_v5 }
  0x26   :  { %415 = vmatpush.bf16.msra.mxu1 %v643_v21  ;;  %709 = vmatpush.bf16.msra.mxu3 %v643_v21 }
  0x27   :  { %240 = vmatpush.bf16.msra.mxu0 %v626_v6  ;;  %702 = vmatpush.bf16.msra.mxu2 %v626_v6 }
  0x2a   :  { %416 = vmatpush.bf16.msra.mxu1 %v642_v22  ;;  %710 = vmatpush.bf16.msra.mxu3 %v642_v22 }
  0x2b   :  { %241 = vmatpush.bf16.msra.mxu0 %v625_v7  ;;  %703 = vmatpush.bf16.msra.mxu2 %v625_v7 }
  0x2e   :  { %242 = vmatmul.bf16.vlgmr.msra.gmra.mxu0 %v633_v8  ;;  %262 = vmatmul.bf16.vlgmr.msra.gmra.mxu2 %v637_v9 }
  0x2f   :  { %417 = vmatpush.bf16.msra.mxu1 %v641_v23  ;;  %711 = vmatpush.bf16.msra.mxu3 %v641_v23 }
  0x3e   :  { %247 = vmatmul.bf16.gmra.mxu0 %v634_v10  ;;  %267 = vmatmul.bf16.gmra.mxu2 %v638_v11 }
  0x4e   :  { %252 = vmatmul.bf16.gmra.mxu0 %v635_v16  ;;  %272 = vmatmul.bf16.gmra.mxu2 %v639_v17 }
  0x5e   :  { %257 = vmatmul.bf16.gmra.mxu0 %v636_v19  ;;  %277 = vmatmul.bf16.gmra.mxu2 %v640_v20 }
  0xab   :  { %v243_v24 = vpop.f32.mrf.mxu0 }
  0xb1   :  { %v263_v25 = vpop.f32.mrf.mxu2 }
  0xb3   :  { %v245_v26 = vpop.f32.mrf.mxu0 }
  0xb4   :  { %v334_v27 = vpack.c.bf16 %v245_v26, %v243_v24 }
  0xb6   :  { %418 = vmatmul.bf16.vlgmr.msra.gmra.mxu1 %v334_v27 }
  0xb9   :  { %v265_v28 = vpop.f32.mrf.mxu2 }
  0xba   :  { %v338_v29 = vpack.c.bf16 %v265_v28, %v263_v25 }
  0xbb   :  { %v248_v30 = vpop.f32.mrf.mxu0 }
  0xbc   :  { %438 = vmatmul.bf16.vlgmr.msra.gmra.mxu3 %v338_v29 }
  0xc1   :  { %v268_v31 = vpop.f32.mrf.mxu2 }
  0xc3   :  { %v250_v32 = vpop.f32.mrf.mxu0 }
  0xc4   :  { %v335_v33 = vpack.c.bf16 %v250_v32, %v248_v30 }
  0xc6   :  { %423 = vmatmul.bf16.gmra.mxu1 %v335_v33 }
  0xc9   :  { %v270_v34 = vpop.f32.mrf.mxu2 }
  0xca   :  { %v339_v35 = vpack.c.bf16 %v270_v34, %v268_v31 }
  0xcb   :  { %v253_v36 = vpop.f32.mrf.mxu0 }
  0xcc   :  { %443 = vmatmul.bf16.gmra.mxu3 %v339_v35 }
  0xd1   :  { %v273_v37 = vpop.f32.mrf.mxu2 }
  0xd3   :  { %v255_v38 = vpop.f32.mrf.mxu0 }
  0xd4   :  { %v336_v39 = vpack.c.bf16 %v255_v38, %v253_v36 }
  0xd6   :  { %428 = vmatmul.bf16.gmra.mxu1 %v336_v39 }
  0xd9   :  { %v275_v40 = vpop.f32.mrf.mxu2 }
  0xda   :  { %v340_v41 = vpack.c.bf16 %v275_v40, %v273_v37 }
  0xdb   :  { %v258_v42 = vpop.f32.mrf.mxu0 }
  0xdc   :  { %448 = vmatmul.bf16.gmra.mxu3 %v340_v41 }
  0xe1   :  { %v278_v43 = vpop.f32.mrf.mxu2 }
  0xe3   :  { %v260_v44 = vpop.f32.mrf.mxu0 }
  0xe4   :  { %v337_v45 = vpack.c.bf16 %v260_v44, %v258_v42 }
  0xe6   :  { %433 = vmatmul.bf16.gmra.mxu1 %v337_v45 }
  0xe9   :  { %v280_v46 = vpop.f32.mrf.mxu2 }
  0xea   :  { %v341_v47 = vpack.c.bf16 %v280_v46, %v278_v43 }
  0xec   :  { %453 = vmatmul.bf16.gmra.mxu3 %v341_v47 }
 0x133   :  { %v419_v48 = vpop.f32.mrf.mxu1 }
 0x134   :  { %v420_v50 = vadd.f32 %v718_v49, %v419_v48 }
 0x136   :  { %v459_v53 = vmax.f32 %v420_v50, 0.0 }
 0x13b   :  { %v421_v51 = vpop.f32.mrf.mxu1 }
 0x13c   :  { %v422_v52 = vadd.f32 %v718_v49, %v421_v51 }
 0x13e   :  { %v460_v54 = vmax.f32 %v422_v52, 0.0 }
 0x13f   :  { %v439_v55 = vpop.f32.mrf.mxu3 }
 0x140   :  { %v652_v56 = vpack.c.bf16 %v460_v54, %v459_v53  ;;  %v440_v58 = vadd.f32 %v718_v49, %v439_v55 }
 0x142   :  { %653 = vst [vmem:[#allocation9] sm:$0xff] %v652_v56   ;;  %v467_v61 = vmax.f32 %v440_v58, 0.0 }
 0x143   :  { %v424_v57 = vpop.f32.mrf.mxu1 }
 0x144   :  { %v425_v62 = vadd.f32 %v718_v49, %v424_v57 }
 0x146   :  { %v461_v3 = vmax.f32 %v425_v62, 0.0 }
 0x147   :  { %v441_v59 = vpop.f32.mrf.mxu3 }
 0x148   :  { %v442_v60 = vadd.f32 %v718_v49, %v441_v59 }
 0x14a   :  { %v468_v63 = vmax.f32 %v442_v60, 0.0 }
 0x14b   :  { %v426_v0 = vpop.f32.mrf.mxu1 }
 0x14c   :  { %v672_v1 = vpack.c.bf16 %v468_v63, %v467_v61  ;;  %v427_v2 = vadd.f32 %v718_v49, %v426_v0 }
 0x14e   :  { %692 = vst [vmem:[#allocation9 + $0x20] sm:$0xff] %v672_v1   ;;  %v462_v4 = vmax.f32 %v427_v2, 0.0 }
 0x14f   :  { %v444_v5 = vpop.f32.mrf.mxu3 }
 0x150   :  { %v657_v6 = vpack.c.bf16 %v462_v4, %v461_v3  ;;  %v445_v8 = vadd.f32 %v718_v49, %v444_v5 }
 0x152   :  { %689 = vst [vmem:[#allocation9 + $0x8] sm:$0xff] %v657_v6   ;;  %v469_v11 = vmax.f32 %v445_v8, 0.0 }
 0x153   :  { %v429_v7 = vpop.f32.mrf.mxu1 }
 0x154   :  { %v430_v12 = vadd.f32 %v718_v49, %v429_v7 }
 0x156   :  { %v463_v17 = vmax.f32 %v430_v12, 0.0 }
 0x157   :  { %v446_v9 = vpop.f32.mrf.mxu3 }
 0x158   :  { %v447_v10 = vadd.f32 %v718_v49, %v446_v9 }
 0x15a   :  { %v470_v13 = vmax.f32 %v447_v10, 0.0 }
 0x15b   :  { %v431_v14 = vpop.f32.mrf.mxu1 }
 0x15c   :  { %v677_v15 = vpack.c.bf16 %v470_v13, %v469_v11  ;;  %v432_v16 = vadd.f32 %v718_v49, %v431_v14 }
 0x15e   :  { %693 = vst [vmem:[#allocation9 + $0x28] sm:$0xff] %v677_v15   ;;  %v464_v18 = vmax.f32 %v432_v16, 0.0 }
 0x15f   :  { %v449_v19 = vpop.f32.mrf.mxu3 }
 0x160   :  { %v662_v20 = vpack.c.bf16 %v464_v18, %v463_v17  ;;  %v450_v22 = vadd.f32 %v718_v49, %v449_v19 }
 0x162   :  { %690 = vst [vmem:[#allocation9 + $0x10] sm:$0xff] %v662_v20   ;;  %v471_v25 = vmax.f32 %v450_v22, 0.0 }
 0x163   :  { %v434_v21 = vpop.f32.mrf.mxu1 }
 0x164   :  { %v435_v26 = vadd.f32 %v718_v49, %v434_v21 }
 0x166   :  { %v465_v31 = vmax.f32 %v435_v26, 0.0 }
 0x167   :  { %v451_v23 = vpop.f32.mrf.mxu3 }
 0x168   :  { %v452_v24 = vadd.f32 %v718_v49, %v451_v23 }
 0x16a   :  { %v472_v27 = vmax.f32 %v452_v24, 0.0 }
 0x16b   :  { %v436_v28 = vpop.f32.mrf.mxu1 }
 0x16c   :  { %v682_v29 = vpack.c.bf16 %v472_v27, %v471_v25  ;;  %v437_v30 = vadd.f32 %v718_v49, %v436_v28 }
 0x16e   :  { %694 = vst [vmem:[#allocation9 + $0x30] sm:$0xff] %v682_v29   ;;  %v466_v32 = vmax.f32 %v437_v30, 0.0 }
 0x16f   :  { %v454_v33 = vpop.f32.mrf.mxu3 }
 0x170   :  { %v667_v34 = vpack.c.bf16 %v466_v32, %v465_v31  ;;  %v455_v35 = vadd.f32 %v718_v49, %v454_v33 }
 0x172   :  { %691 = vst [vmem:[#allocation9 + $0x18] sm:$0xff] %v667_v34   ;;  %v473_v38 = vmax.f32 %v455_v35, 0.0 }
 0x177   :  { %v456_v36 = vpop.f32.mrf.mxu3 }
 0x178   :  { %v457_v37 = vadd.f32 %v718_v49, %v456_v36 }
 0x17a   :  { %v474_v39 = vmax.f32 %v457_v37, 0.0 }
 0x17c   :  { %v687_v40 = vpack.c.bf16 %v474_v39, %v473_v38 }
 0x17e   :  { %695 = vst [vmem:[#allocation9 + $0x38] sm:$0xff] %v687_v40  }
 0x17f   :  { %519 = dma.vmem_to_hbm [thread:$0]  %s512_s5, 1024, %s514_s8, [#allocation5], %s822_s23, %s822_s23, %s823_s24  }
 0x180   :  { %819 = dma.done.wait [#allocation5], 1024  }
 0x181   :  { %820 = vsyncadd [#allocation5], 4294966272 }
 0x182   :  { %524 = vsyncpa [#allocation4], 1 }
 0x183   :  { %525 = vsyncpa [#allocation7], 1 }
 0x184   :  { %526 = vsyncpa [#allocation5], 1 }

</bundles_post_ra>
